<compile_context>
chip_gen: v7x
topology: tpu7x:2x2x1
jax: 0.10.0
libtpu: 0.0.40
codegen_flags: <defaults>
</compile_context>

<pallas_src>
import jax
import jax.numpy as jnp
import numpy as np
from jax import lax
from jax.experimental import pallas as pl
from jax.experimental.pallas import tpu as pltpu

_BN_EPS = 1e-5


def _round_up(x, m):
    return (x + m - 1) // m * m


def _pick_tile_m(m, k, c_pad):
    """Largest M tile (<=2048 rows) dividing M that fits a ~12 MiB VMEM budget."""
    budget = 12 * 1024 * 1024      # safe under v5e's 16 MiB default scoped VMEM
    for t in (2048, 1024, 512, 256, 128):
        if m % t == 0:
            # double-buffered bf16 patch tile + f32 y tile + resident bf16 weights
            vmem = 2 * t * k * 2 + 2 * t * c_pad * 4 + 2 * k * c_pad * 2
            if vmem <= budget:
                return t
    return m                        # tiny layers: single full-M block


# ---------------------------------------------------------------------------
# Pallas kernels
# ---------------------------------------------------------------------------
def _gemm_stats_kernel(p_ref, w_ref, y_ref, sum_ref, ssq_ref):
    """Pass 1: GEMM tile -> f32 y tile + per-channel sum / sum-of-squares."""
    @pl.when(pl.program_id(0) == 0)
    def _():
        sum_ref[...] = jnp.zeros_like(sum_ref)
        ssq_ref[...] = jnp.zeros_like(ssq_ref)

    y = jnp.dot(p_ref[...], w_ref[...], preferred_element_type=jnp.float32)
    sum_ref[...] += jnp.sum(y, axis=0, keepdims=True)
    ssq_ref[...] += jnp.sum(y * y, axis=0, keepdims=True)
    y_ref[...] = y


def _make_bn_apply_kernel(use_relu):
    def kernel(y_ref, scale_ref, shift_ref, o_ref):
        """Pass 2: elementwise-only BN affine (+ReLU); f32 math, bf16 store."""
        y = y_ref[...] * scale_ref[...] + shift_ref[...]
        if use_relu:
            y = jnp.maximum(y, 0.0)
        o_ref[...] = y.astype(o_ref.dtype)
    return kernel


def _make_gemm_affine_kernel(use_relu):
    def kernel(p_ref, w_ref, scale_ref, shift_ref, o_ref):
        """bn=False path: single fused GEMM + bias (+ReLU)."""
        y = jnp.dot(p_ref[...], w_ref[...], preferred_element_type=jnp.float32)
        y = y * scale_ref[...] + shift_ref[...]
        if use_relu:
            y = jnp.maximum(y, 0.0)
        o_ref[...] = y.astype(o_ref.dtype)
    return kernel


# ---------------------------------------------------------------------------
# pallas_call wrappers
# ---------------------------------------------------------------------------
def _gemm_stats_call(patches, w2d, tm):
    m, k = patches.shape
    c_pad = w2d.shape[1]
    flops = 2 * m * k * c_pad + 3 * m * c_pad
    bytes_accessed = patches.size * 2 + w2d.size * 2 + m * c_pad * 4 + 2 * c_pad * 4
    return pl.pallas_call(
        _gemm_stats_kernel,
        out_shape=(jax.ShapeDtypeStruct((m, c_pad), jnp.float32),
                   jax.ShapeDtypeStruct((1, c_pad), jnp.float32),
                   jax.ShapeDtypeStruct((1, c_pad), jnp.float32)),
        grid=(m // tm,),
        in_specs=[pl.BlockSpec((tm, k), lambda i: (i, 0)),
                  pl.BlockSpec((k, c_pad), lambda i: (0, 0))],
        out_specs=(pl.BlockSpec((tm, c_pad), lambda i: (i, 0)),
                   pl.BlockSpec((1, c_pad), lambda i: (0, 0)),
                   pl.BlockSpec((1, c_pad), lambda i: (0, 0))),
        compiler_params=pltpu.CompilerParams(
            dimension_semantics=("arbitrary",)),   # sum/ssq accumulate across M
        cost_estimate=pl.CostEstimate(flops=flops, transcendentals=0,
                                      bytes_accessed=bytes_accessed),
    )(patches, w2d)


def _bn_apply_call(y, scale, shift, tm, use_relu):
    m, c_pad = y.shape
    return pl.pallas_call(
        _make_bn_apply_kernel(use_relu),
        out_shape=jax.ShapeDtypeStruct((m, c_pad), jnp.bfloat16),
        grid=(m // tm,),
        in_specs=[pl.BlockSpec((tm, c_pad), lambda i: (i, 0)),
                  pl.BlockSpec((1, c_pad), lambda i: (0, 0)),
                  pl.BlockSpec((1, c_pad), lambda i: (0, 0))],
        out_specs=pl.BlockSpec((tm, c_pad), lambda i: (i, 0)),
        compiler_params=pltpu.CompilerParams(
            dimension_semantics=("parallel",)),
        cost_estimate=pl.CostEstimate(flops=2 * m * c_pad, transcendentals=0,
                                      bytes_accessed=m * c_pad * 6 + 2 * c_pad * 4),
    )(y, scale, shift)


def _gemm_affine_call(patches, w2d, scale, shift, tm, use_relu):
    m, k = patches.shape
    c_pad = w2d.shape[1]
    flops = 2 * m * k * c_pad
    bytes_accessed = patches.size * 2 + w2d.size * 2 + m * c_pad * 2 + 2 * c_pad * 4
    return pl.pallas_call(
        _make_gemm_affine_kernel(use_relu),
        out_shape=jax.ShapeDtypeStruct((m, c_pad), jnp.bfloat16),
        grid=(m // tm,),
        in_specs=[pl.BlockSpec((tm, k), lambda i: (i, 0)),
                  pl.BlockSpec((k, c_pad), lambda i: (0, 0)),
                  pl.BlockSpec((1, c_pad), lambda i: (0, 0)),
                  pl.BlockSpec((1, c_pad), lambda i: (0, 0))],
        out_specs=pl.BlockSpec((tm, c_pad), lambda i: (i, 0)),
        compiler_params=pltpu.CompilerParams(
            dimension_semantics=("parallel",)),
        cost_estimate=pl.CostEstimate(flops=flops, transcendentals=0,
                                      bytes_accessed=bytes_accessed),
    )(patches, w2d, scale, shift)


# ---------------------------------------------------------------------------
# im2col (plain-JAX data movement, bf16) and the BasicConv wrappers (NHWC)
# ---------------------------------------------------------------------------
def _im2col_nhwc(x, kh, kw, stride, padding, dilation):
    n, h, w, c = x.shape
    if padding:
        x = jnp.pad(x, ((0, 0), (padding, padding), (padding, padding), (0, 0)))
    oh = (h + 2 * padding - dilation * (kh - 1) - 1) // stride + 1
    ow = (w + 2 * padding - dilation * (kw - 1) - 1) // stride + 1
    cols = []
    for i in range(kh):
        for j in range(kw):
            hi, wj = i * dilation, j * dilation
            cols.append(x[:, hi:hi + stride * oh:stride,
                          wj:wj + stride * ow:stride, :])       # [N, OH, OW, C]
    p = jnp.stack(cols, axis=3)                                  # [N, OH, OW, KHKW, C]
    return p.reshape(n * oh * ow, kh * kw * c), oh, ow


# TODO(synk): 3x3 convs still materialize the im2col slab (~9x activation reads);
# an implicit-GEMM kernel looping over the taps with haloed tiles would cut it.
def _conv_core(x, w2d, gamma, beta, bias, *, stride, padding, dilation, relu):
    """Shared conv + (BN | bias) + optional ReLU.  x: [N,H,W,Cin] bf16 NHWC."""
    n, _, _, cin = x.shape
    k, ctot = w2d.shape
    ks = int(round((k // cin) ** 0.5))
    assert ks * ks * cin == k, "non-square / grouped kernels not supported"

    patches, oh, ow = _im2col_nhwc(x, ks, ks, stride, padding, dilation)  # [M,K] bf16
    m = patches.shape[0]
    c_pad = _round_up(ctot, 128)
    w2d_p = jnp.pad(w2d, ((0, 0), (0, c_pad - ctot))) if c_pad != ctot else w2d
    tm = _pick_tile_m(m, k, c_pad)

    if gamma is not None:
        # BatchNorm2d in training mode: biased batch statistics over N*OH*OW,
        # accumulated in the same pass that produces y (no GEMM recompute).
        y, ssum, ssq = _gemm_stats_call(patches, w2d_p, tm)
        mean = ssum / float(m)
        var = jnp.maximum(ssq / float(m) - mean * mean, 0.0)
        gamma_p = jnp.pad(gamma, (0, c_pad - ctot)).reshape(1, c_pad)
        beta_p = jnp.pad(beta, (0, c_pad - ctot)).reshape(1, c_pad)
        scale = gamma_p * lax.rsqrt(var + _BN_EPS)
        shift = beta_p - mean * scale
        out = _bn_apply_call(y, scale, shift, tm, relu)          # [M, Cp] bf16
    else:
        # bn=False branch of BasicConv: plain conv bias, single fused call.
        scale = jnp.ones((1, c_pad), jnp.float32)
        shift = jnp.pad(bias, (0, c_pad - ctot)).reshape(1, c_pad)
        out = _gemm_affine_call(patches, w2d_p, scale, shift, tm, relu)

    if c_pad != ctot:
        out = out[:, :ctot]                                      # drop lane padding
    return out.reshape(n, oh, ow, ctot)


def basic_conv(x, p, *, stride=1, padding=0, dilation=1, relu=True):
    """BasicConv forward (NHWC, bf16 in / bf16 out) via the Pallas kernels."""
    return _conv_core(x, p["w2d"], p.get("gamma"), p.get("beta"), p.get("bias"),
                      stride=stride, padding=padding, dilation=dilation, relu=relu)


def basic_conv_multi(x, p_list, *, stride=1, padding=0, dilation=1, relu=False):
    """Fuse several BN convs with identical hyperparams and input into one GEMM."""
    w2d = jnp.concatenate([p["w2d"] for p in p_list], axis=1)
    gamma = jnp.concatenate([p["gamma"] for p in p_list])
    beta = jnp.concatenate([p["beta"] for p in p_list])
    out = _conv_core(x, w2d, gamma, beta, None,
                     stride=stride, padding=padding, dilation=dilation, relu=relu)
    couts = [int(p["w2d"].shape[1]) for p in p_list]
    offs = np.concatenate([[0], np.cumsum(couts)])
    return tuple(out[..., int(offs[i]):int(offs[i + 1])]
                 for i in range(len(p_list)))


def _maxpool2x2_nhwc(x, ceil_mode=False):
    # TODO(synk): MaxPool2d kept as plain-JAX reshape/max (pure data movement).
    n, h, w, c = x.shape
    ph, pw = h % 2, w % 2
    if ceil_mode and (ph or pw):
        x = jnp.pad(x, ((0, 0), (0, ph), (0, pw), (0, 0)),
                    constant_values=-jnp.inf)
        h, w = h + ph, w + pw
    else:
        h, w = h - ph, w - pw
        x = x[:, :h, :w, :]
    return x.reshape(n, h // 2, 2, w // 2, 2, c).max(axis=(2, 4))


# ---------------------------------------------------------------------------
# Backbone structure (shared by the Pallas path and the pure-JAX reference)
# ---------------------------------------------------------------------------
def _rfb_block(x, p, conv, conv_multi):
    # BasicRFB(128, 128, stride=1, scale=1.0): vision=1, map_reduce=8 -> inter=16.
    # The four 1x1 relu=False convs reading x directly are fused into one GEMM
    # (exact: BatchNorm statistics are per-channel).
    b0, b1, b2, short = conv_multi(
        x, [p["b0_0"], p["b1_0"], p["b2_0"], p["shortcut"]], relu=False)
    b0 = conv(b0, p["b0_1"], padding=1)
    b0 = conv(b0, p["b0_2"], padding=2, dilation=2, relu=False)
    b1 = conv(b1, p["b1_1"], padding=1)
    b1 = conv(b1, p["b1_2"], padding=3, dilation=3, relu=False)
    b2 = conv(b2, p["b2_1"], padding=1)
    b2 = conv(b2, p["b2_2"], padding=1)
    b2 = conv(b2, p["b2_3"], padding=5, dilation=5, relu=False)
    out = jnp.concatenate([b0, b1, b2], axis=-1)
    out = conv(out, p["linear"], relu=False)
    res = out.astype(jnp.float32) * 1.0 + short.astype(jnp.float32)   # scale = 1.0
    return jnp.maximum(res, 0.0).astype(out.dtype)


def _backbone(x, params, conv, conv_multi, pool):
    x = conv(x, params["conv1_1"], padding=1)
    x = conv(x, params["conv1_2"], padding=1)
    x = pool(x)
    x = conv(x, params["conv2_1"], padding=1)
    x = conv(x, params["conv2_2"], padding=1)
    x = pool(x)
    x = conv(x, params["conv3_1"])
    x = conv(x, params["conv3_2"], padding=1)
    x = pool(x, ceil_mode=True)                    # pool3: ceil_mode = bn = True
    x = conv(x, params["conv4_1"])
    x = conv(x, params["conv4_2"], padding=1)
    x = _rfb_block(x, params["conv4_3"], conv, conv_multi)
    f1 = x
    x = pool(x)
    x = conv(x, params["conv5_1"], relu=False)
    x = conv(x, params["conv5_2"], padding=1)
    f2 = x
    x = conv(x, params["conv6_1"], relu=False)
    x = conv(x, params["conv6_2"], padding=1, stride=2)
    f3 = x
    x = conv(x, params["conv7_1"], relu=False)
    x = conv(x, params["conv7_2"], padding=1, stride=2)
    f4 = x
    return f1, f2, f3, f4


@jax.jit
def backbone_forward(packed_params, x_nchw):
    """Pallas-backed Backbone.  NCHW f32 in, (f1..f4) NCHW f32 out."""
    x = jnp.transpose(x_nchw, (0, 2, 3, 1)).astype(jnp.bfloat16)   # NHWC bf16
    feats = _backbone(x, packed_params, basic_conv, basic_conv_multi,
                      _maxpool2x2_nhwc)
    return tuple(jnp.transpose(f, (0, 3, 1, 2)).astype(jnp.float32) for f in feats)


# ---------------------------------------------------------------------------
# Pure-JAX reference (lax.conv, NHWC) — same bf16 operands / hand-off points
# ---------------------------------------------------------------------------
def _ref_conv(x, p, *, stride=1, padding=0, dilation=1, relu=True):
    w = jnp.transpose(p["weight"], (2, 3, 1, 0)).astype(jnp.bfloat16)   # HWIO
    y = lax.conv_general_dilated(
        x.astype(jnp.bfloat16), w,
        window_strides=(stride, stride),
        padding=((padding, padding), (padding, padding)),
        rhs_dilation=(dilation, dilation),
        dimension_numbers=("NHWC", "HWIO", "NHWC"),
        preferred_element_type=jnp.float32)
    if "gamma" in p:
        mean = jnp.mean(y, axis=(0, 1, 2), keepdims=True)
        var = jnp.mean(jnp.square(y - mean), axis=(0, 1, 2), keepdims=True)
        y = (y - mean) * lax.rsqrt(var + _BN_EPS)
        y = y * p["gamma"].reshape(1, 1, 1, -1) + p["beta"].reshape(1, 1, 1, -1)
    else:
        y = y + p["bias"].reshape(1, 1, 1, -1)
    if relu:
        y = jnp.maximum(y, 0.0)
    return y.astype(jnp.bfloat16)        # same bf16 hand-off point as Pallas path


def _ref_conv_multi(x, p_list, *, stride=1, padding=0, dilation=1, relu=False):
    return tuple(_ref_conv(x, p, stride=stride, padding=padding,
                           dilation=dilation, relu=relu) for p in p_list)


@jax.jit
def backbone_reference(raw_params, x_nchw):
    x = jnp.transpose(x_nchw, (0, 2, 3, 1)).astype(jnp.bfloat16)
    feats = _backbone(x, raw_params, _ref_conv, _ref_conv_multi, _maxpool2x2_nhwc)
    return tuple(jnp.transpose(f, (0, 3, 1, 2)).astype(jnp.float32) for f in feats)


# ---------------------------------------------------------------------------
# Parameter init (PyTorch [Cout, Cin, KH, KW] layout) + one-time packing
# ---------------------------------------------------------------------------
def _init_conv(key, cin, cout, ksize, bn=True):
    kW, kg, kb = jax.random.split(key, 3)
    fan_in = cin * ksize * ksize
    w = jax.random.normal(kW, (cout, cin, ksize, ksize), jnp.float32) * (2.0 / fan_in) ** 0.5
    if bn:
        return {"weight": w,
                "gamma": 1.0 + 0.1 * jax.random.normal(kg, (cout,), jnp.float32),
                "beta": 0.1 * jax.random.normal(kb, (cout,), jnp.float32)}
    return {"weight": w,
            "bias": 0.1 * jax.random.normal(kb, (cout,), jnp.float32)}


def pack_conv_params(raw):
    """Pre-pack one BasicConv for the Pallas path: w2d = [K, Cout] bf16."""
    w = raw["weight"]
    cout, cin, kh, kw = w.shape
    packed = {"w2d": jnp.transpose(w, (2, 3, 1, 0))
              .reshape(kh * kw * cin, cout).astype(jnp.bfloat16)}
    if "gamma" in raw:
        packed["gamma"] = raw["gamma"].astype(jnp.float32)
        packed["beta"] = raw["beta"].astype(jnp.float32)
    else:
        packed["bias"] = raw["bias"].astype(jnp.float32)
    return packed


def pack_backbone_params(raw_params):
    packed = {}
    for name, p in raw_params.items():
        if name == "conv4_3":
            packed[name] = {k: pack_conv_params(v) for k, v in p.items()}
        else:
            packed[name] = pack_conv_params(p)
    return packed


def init_backbone_params(key):
    cfg = {
        "conv1_1": (3, 32, 3), "conv1_2": (32, 32, 3),
        "conv2_1": (32, 64, 3), "conv2_2": (64, 64, 3),
        "conv3_1": (64, 128, 1), "conv3_2": (128, 128, 3),
        "conv4_1": (128, 128, 1), "conv4_2": (128, 128, 3),
        "conv5_1": (128, 64, 1), "conv5_2": (64, 128, 3),
        "conv6_1": (128, 64, 1), "conv6_2": (64, 128, 3),
        "conv7_1": (128, 64, 1), "conv7_2": (64, 128, 3),
    }
    rfb_cfg = {   # BasicRFB(128, 128): inter_planes = 128 // 8 = 16
        "b0_0": (128, 16, 1), "b0_1": (16, 32, 3), "b0_2": (32, 32, 3),
        "b1_0": (128, 16, 1), "b1_1": (16, 32, 3), "b1_2": (32, 32, 3),
        "b2_0": (128, 16, 1), "b2_1": (16, 24, 3), "b2_2": (24, 32, 3), "b2_3": (32, 32, 3),
        "linear": (96, 128, 1), "shortcut": (128, 128, 1),
    }
    names = list(cfg) + ["rfb/" + n for n in rfb_cfg]
    keys = jax.random.split(key, len(names))
    params, rfb = {}, {}
    for name, k in zip(names, keys):
        if name.startswith("rfb/"):
            cin, cout, ks = rfb_cfg[name[4:]]
            rfb[name[4:]] = _init_conv(k, cin, cout, ks)
        else:
            cin, cout, ks = cfg[name]
            params[name] = _init_conv(k, cin, cout, ks)
    params["conv4_3"] = rfb
    return params


# ---------------------------------------------------------------------------
# Correctness harness
# ---------------------------------------------------------------------------
def _to_np(a):
    return np.asarray(a.astype(jnp.float32))


def _check_layer(key, x_shape, cin, cout, ks, *, stride=1, padding=0, dilation=1,
                 relu=True, bn=True, name=""):
    kp, kx = jax.random.split(key)
    raw = _init_conv(kp, cin, cout, ks, bn=bn)
    packed = pack_conv_params(raw)
    x = jax.random.normal(kx, x_shape, jnp.float32).astype(jnp.bfloat16)
    got = basic_conv(x, packed, stride=stride, padding=padding,
                     dilation=dilation, relu=relu)
    want = _ref_conv(x, raw, stride=stride, padding=padding,
                     dilation=dilation, relu=relu)
    np.testing.assert_allclose(_to_np(got), _to_np(want), rtol=5e-2, atol=5e-2,
                               err_msg=f"per-layer check failed: {name}")


def _check_fused_multi(key):
    kp0, kp1, kp2, kx = jax.random.split(key, 4)
    raws = [_init_conv(kp0, 64, 16, 1), _init_conv(kp1, 64, 16, 1),
            _init_conv(kp2, 64, 128, 1)]
    packs = [pack_conv_params(r) for r in raws]
    x = jax.random.normal(kx, (2, 8, 8, 64), jnp.float32).astype(jnp.bfloat16)
    got = basic_conv_multi(x, packs, relu=False)
    want = _ref_conv_multi(x, raws, relu=False)
    for g, w in zip(got, want):
        np.testing.assert_allclose(_to_np(g), _to_np(w), rtol=5e-2, atol=5e-2,
                                   err_msg="fused 1x1 group check failed")


if __name__ == "__main__":
    root = jax.random.PRNGKey(0)
    k_params, k_x, *k_tests = jax.random.split(root, 9)

    # ---- per-layer checks (same input to the Pallas conv and the lax.conv ref)
    _check_layer(k_tests[0], (2, 16, 16, 16), 16, 40, 3, padding=1,
                 name="3x3 bn relu, Cout padding")
    _check_layer(k_tests[1], (2, 8, 8, 64), 64, 128, 1, relu=False,
                 name="1x1 bn no-relu")
    _check_layer(k_tests[2], (2, 12, 12, 24), 24, 32, 3, padding=5, dilation=5,
                 relu=False, name="3x3 dilation-5 bn")
    _check_layer(k_tests[3], (2, 16, 16, 32), 32, 64, 3, padding=1, stride=2,
                 name="3x3 stride-2 bn relu")
    _check_layer(k_tests[4], (2, 8, 8, 16), 16, 32, 3, padding=1, bn=False,
                 name="3x3 bias relu (bn=False)")
    _check_fused_multi(k_tests[5])

    # ---- end-to-end backbone
    raw_params = init_backbone_params(k_params)
    packed_params = pack_backbone_params(raw_params)
    # Batch 8 keeps every train-mode BatchNorm reduction (over N*OH*OW) at >= 8
    # samples even at the 1x1 late feature maps.
    x = jax.random.normal(k_x, (8, 3, 32, 32), dtype=jnp.float32)

    feats = jax.block_until_ready(backbone_forward(packed_params, x))
    refs = jax.block_until_ready(backbone_reference(raw_params, x))

    expected = [(8, 128, 4, 4), (8, 128, 2, 2), (8, 128, 1, 1), (8, 128, 1, 1)]
    for idx, (f, r, shp) in enumerate(zip(feats, refs, expected)):
        assert f.shape == shp, (f.shape, shp)
        f_np, r_np = np.asarray(f), np.asarray(r)
        assert np.all(np.isfinite(f_np)), f"non-finite values in feature {idx}"
        # 26 stacked bf16 conv+BN layers drift chaotically between two correct
        # implementations, so the end-to-end check is statistical; the tight
        # per-layer checks above are the real correctness gate.
        diff = np.abs(f_np - r_np)
        tol = 0.1 + 0.1 * np.abs(r_np)
        frac_bad = float(np.mean(diff > tol))
        assert frac_bad <= 0.02, \
            f"feature {idx}: {frac_bad:.4f} of elements outside tolerance"
        assert float(diff.max()) <= 1.0, \
            f"feature {idx}: max |diff| = {float(diff.max()):.3f}"

    print("KERNEL_OK")
</pallas_src>

<mosaic_0001>
module attributes {stable_mosaic.version = 11 : i64} {
  func.func @_gemm_stats_kernel(%arg0: i32, %arg1: memref<512x144xbf16, #tpu.memory_space<vmem>>, %arg2: memref<144x128xbf16, #tpu.memory_space<vmem>>, %arg3: memref<512x128xf32, #tpu.memory_space<vmem>>, %arg4: memref<1x128xf32, #tpu.memory_space<vmem>>, %arg5: memref<1x128xf32, #tpu.memory_space<vmem>>) attributes {dimension_semantics = [#tpu.dimension_semantics<arbitrary>], iteration_bounds = array<i64: 1>, scalar_prefetch = 0 : i64, scratch_operands = 0 : i64, tpu.core_type = #tpu.core_type<tc>, window_params = [{transform_indices = @transform_0, window_bounds = array<i64: 512, 144>}, {pipeline_mode = #tpu.pipeline_mode<synchronous>, transform_indices = @transform_1, window_bounds = array<i64: 144, 128>}, {transform_indices = @transform_2, window_bounds = array<i64: 512, 128>}, {pipeline_mode = #tpu.pipeline_mode<synchronous>, transform_indices = @transform_3, window_bounds = array<i64: 1, 128>}, {pipeline_mode = #tpu.pipeline_mode<synchronous>, transform_indices = @transform_4, window_bounds = array<i64: 1, 128>}]} {
    %c0_i32 = arith.constant 0 : i32
    %0 = arith.cmpi eq, %arg0, %c0_i32 : i32
    %1 = arith.extui %0 : i1 to i32
    %c0_i32_0 = arith.constant 0 : i32
    %2 = arith.cmpi ne, %1, %c0_i32_0 : i32
    scf.if %2 {
      %cst_16 = arith.constant 0.000000e+00 : f32
      %18 = vector.broadcast %cst_16 : f32 to vector<1x128xf32>
      %c0_17 = arith.constant 0 : index
      %c0_18 = arith.constant 0 : index
      %19 = vector.load %arg4[%c0_17, %c0_18] : memref<1x128xf32, #tpu.memory_space<vmem>>, vector<1x128xf32>
      tpu.vector_store %arg4[%c0_17, %c0_18], %18 {strides = array<i32>} : memref<1x128xf32, #tpu.memory_space<vmem>>, vector<1x128xf32>,
      %cst_19 = arith.constant 0.000000e+00 : f32
      %20 = vector.broadcast %cst_19 : f32 to vector<1x128xf32>
      %c0_20 = arith.constant 0 : index
      %c0_21 = arith.constant 0 : index
      %21 = vector.load %arg5[%c0_20, %c0_21] : memref<1x128xf32, #tpu.memory_space<vmem>>, vector<1x128xf32>
      tpu.vector_store %arg5[%c0_20, %c0_21], %20 {strides = array<i32>} : memref<1x128xf32, #tpu.memory_space<vmem>>, vector<1x128xf32>,
    } else {
    }
    %c0 = arith.constant 0 : index
    %c0_1 = arith.constant 0 : index
    %3 = vector.load %arg1[%c0, %c0_1] : memref<512x144xbf16, #tpu.memory_space<vmem>>, vector<512x144xbf16>
    %c0_2 = arith.constant 0 : index
    %c0_3 = arith.constant 0 : index
    %4 = vector.load %arg2[%c0_2, %c0_3] : memref<144x128xbf16, #tpu.memory_space<vmem>>, vector<144x128xbf16>
    %cst = arith.constant dense<0.000000e+00> : vector<512x128xf32>
    %5 = tpu.matmul %3, %4, %cst {dimension_numbers = #tpu.dot_dimension_numbers<[1], [0], [0], [1], [0, 0, 1, 1], [], []>} : vector<512x144xbf16>, vector<144x128xbf16>, vector<512x128xf32> -> vector<512x128xf32>
    %c0_4 = arith.constant 0 : index
    %c0_5 = arith.constant 0 : index
    %6 = vector.load %arg4[%c0_4, %c0_5] : memref<1x128xf32, #tpu.memory_space<vmem>>, vector<1x128xf32>
    %cst_6 = arith.constant dense<0.000000e+00> : vector<128xf32>
    %7 = vector.multi_reduction <add>, %5, %cst_6 [0] : vector<512x128xf32> to vector<128xf32>
    %8 = vector.shape_cast %7 : vector<128xf32> to vector<1x128xf32>
    %9 = arith.addf %6, %8 : vector<1x128xf32>
    %c0_7 = arith.constant 0 : index
    %c0_8 = arith.constant 0 : index
    %10 = vector.load %arg4[%c0_7, %c0_8] : memref<1x128xf32, #tpu.memory_space<vmem>>, vector<1x128xf32>
    tpu.vector_store %arg4[%c0_7, %c0_8], %9 {strides = array<i32>} : memref<1x128xf32, #tpu.memory_space<vmem>>, vector<1x128xf32>,
    %c0_9 = arith.constant 0 : index
    %c0_10 = arith.constant 0 : index
    %11 = vector.load %arg5[%c0_9, %c0_10] : memref<1x128xf32, #tpu.memory_space<vmem>>, vector<1x128xf32>
    %12 = arith.mulf %5, %5 : vector<512x128xf32>
    %cst_11 = arith.constant dense<0.000000e+00> : vector<128xf32>
    %13 = vector.multi_reduction <add>, %12, %cst_11 [0] : vector<512x128xf32> to vector<128xf32>
    %14 = vector.shape_cast %13 : vector<128xf32> to vector<1x128xf32>
    %15 = arith.addf %11, %14 : vector<1x128xf32>
    %c0_12 = arith.constant 0 : index
    %c0_13 = arith.constant 0 : index
    %16 = vector.load %arg5[%c0_12, %c0_13] : memref<1x128xf32, #tpu.memory_space<vmem>>, vector<1x128xf32>
    tpu.vector_store %arg5[%c0_12, %c0_13], %15 {strides = array<i32>} : memref<1x128xf32, #tpu.memory_space<vmem>>, vector<1x128xf32>,
    %c0_14 = arith.constant 0 : index
    %c0_15 = arith.constant 0 : index
    %17 = vector.load %arg3[%c0_14, %c0_15] : memref<512x128xf32, #tpu.memory_space<vmem>>, vector<512x128xf32>
    tpu.vector_store %arg3[%c0_14, %c0_15], %5 {strides = array<i32>} : memref<512x128xf32, #tpu.memory_space<vmem>>, vector<512x128xf32>,
    return
  }
  func.func @transform_0(%arg0: i32) -> (i32, i32) {
    %c0_i32 = arith.constant 0 : i32
    %c0_i32_0 = arith.constant 0 : i32
    return %arg0, %c0_i32 : i32, i32
  }
  func.func @transform_1(%arg0: i32) -> (i32, i32) {
    %c0_i32 = arith.constant 0 : i32
    %c0_i32_0 = arith.constant 0 : i32
    %c0_i32_1 = arith.constant 0 : i32
    return %c0_i32, %c0_i32_0 : i32, i32
  }
  func.func @transform_2(%arg0: i32) -> (i32, i32) {
    %c0_i32 = arith.constant 0 : i32
    %c0_i32_0 = arith.constant 0 : i32
    return %arg0, %c0_i32 : i32, i32
  }
  func.func @transform_3(%arg0: i32) -> (i32, i32) {
    %c0_i32 = arith.constant 0 : i32
    %c0_i32_0 = arith.constant 0 : i32
    %c0_i32_1 = arith.constant 0 : i32
    return %c0_i32, %c0_i32_0 : i32, i32
  }
  func.func @transform_4(%arg0: i32) -> (i32, i32) {
    %c0_i32 = arith.constant 0 : i32
    %c0_i32_0 = arith.constant 0 : i32
    %c0_i32_1 = arith.constant 0 : i32
    return %c0_i32, %c0_i32_0 : i32, i32
  }
}

</mosaic_0001>

<bundles_post_ra>
// kernel: tpu_custom_call.1
= control target key start
LH: loop header
LB: loop body
LE: loop exit
PB: predicated region body
PF: predicated region fallthrough
CT: control target
= control target key end

     0   :  { %10 = vsyncpa [#allocation3], 0  ;;  %v1453_v1 = vmov 0   ;;  %vm447_vm0 = vcmask 130048   ;;  %s1979_s0 = inlined_call_operand.vmem [shape: bf16[512,144], index: 0, kind: input, shape index: {}]   ;;  %s1980_s1 = inlined_call_operand.vmem [shape: bf16[144,128], index: 1, kind: input, shape index: {}]   ;;  %s1981_s2 = inlined_call_operand.hbm [shape: f32[512,128], index: 2, kind: output, shape index: {0}]   ;;  %s1982_s3 = inlined_call_operand.hbm [shape: f32[1,128], index: 3, kind: output, shape index: {1}]   ;;  %s1983_s4 = inlined_call_operand.hbm [shape: f32[1,128], index: 4, kind: output, shape index: {2}]  }
   0x1   :  { %v1278_v0 = vld [vmem:[%s1980_s1] sm:$0xff]   ;;  %544 = vmatprep.subr.bf16.mxu0 %v1453_v1  ;;  %1253 = vmatprep.subr.bf16.mxu1 %v1453_v1  ;;  %v1279_v2 = vld [vmem:[%s1980_s1 + $0x8] sm:$0xff]   ;;  %v1280_v3 = vld [vmem:[%s1980_s1 + $0x10] sm:$0xff]  }
   0x2   :  { %545 = vmatpush1.bf16.msra.mxu0 %v1278_v0  ;;  %1262 = vmatpush1.bf16.msra.mxu1 %v1278_v0  ;;  %v1281_v4 = vld [vmem:[%s1980_s1 + $0x18] sm:$0xff]   ;;  %v1289_v5 = vld [vmem:[%s1979_s0 + $0x4] ss:$8 sps:$4 sm:$0xff]   ;;  %v1284_v9 = vld [vmem:[%s1980_s1 + $0x30] sm:$0xff]  }
   0x3   :  { %546 = vmatprep.subr.bf16.mxu0 %v1453_v1  ;;  %1254 = vmatprep.subr.bf16.mxu1 %v1453_v1  ;;  %v1282_v6 = vld [vmem:[%s1980_s1 + $0x20] sm:$0xff]   ;;  %v1283_v7 = vld [vmem:[%s1980_s1 + $0x28] sm:$0xff]   ;;  %v1285_v10 = vld [vmem:[%s1980_s1 + $0x38] sm:$0xff]  }
   0x4   :  { %1221 = vmatprep.mubr.msk.bf16.mxu0 %vm447_vm0, %v1289_v5  ;;  %v1313_v8 = vld [vmem:[%s1979_s0 + $0x104] ss:$8 sps:$4 sm:$0xff]   ;;  %v1287_v12 = vld [vmem:[%s1979_s0] ss:$8 sps:$4 sm:$0xff]   ;;  %v1290_v13 = vld [vmem:[%s1979_s0 + $0x14] ss:$8 sps:$4 sm:$0xff]  }
   0x5   :  { %1237 = vmatprep.mubr.msk.bf16.mxu1 %vm447_vm0, %v1313_v8  ;;  %v1286_v11 = vld [vmem:[%s1980_s1 + $0x40] sm:$0xff]   ;;  %v1317_v15 = vld [vmem:[%s1979_s0 + $0x114] ss:$8 sps:$4 sm:$0xff]   ;;  %v1292_v16 = vld [vmem:[%s1979_s0 + $0x10] ss:$8 sps:$4 sm:$0xff]  }
   0x6   :  { %547 = vmatpush1.bf16.msra.mxu0 %v1279_v2  ;;  %1263 = vmatpush1.bf16.msra.mxu1 %v1279_v2  ;;  %v1311_v14 = vld [vmem:[%s1979_s0 + $0x100] ss:$8 sps:$4 sm:$0xff]   ;;  %v1293_v17 = vld [vmem:[%s1979_s0 + $0x24] ss:$8 sps:$4 sm:$0xff]   ;;  %v1319_v18 = vld [vmem:[%s1979_s0 + $0x110] ss:$8 sps:$4 sm:$0xff]  }
   0x7   :  { %548 = vmatprep.subr.bf16.mxu0 %v1453_v1  ;;  %1255 = vmatprep.subr.bf16.mxu1 %v1453_v1  ;;  %v1323_v19 = vld [vmem:[%s1979_s0 + $0x124] ss:$8 sps:$4 sm:$0xff]   ;;  %v1295_v20 = vld [vmem:[%s1979_s0 + $0x20] ss:$8 sps:$4 sm:$0xff]   ;;  %v1296_v21 = vld [vmem:[%s1979_s0 + $0x34] ss:$8 sps:$4 sm:$0xff]  }
   0x8   :  { %v1325_v22 = vld [vmem:[%s1979_s0 + $0x120] ss:$8 sps:$4 sm:$0xff]   ;;  %v1329_v23 = vld [vmem:[%s1979_s0 + $0x134] ss:$8 sps:$4 sm:$0xff]  }
   0xa   :  { %549 = vmatpush1.bf16.msra.mxu0 %v1280_v3  ;;  %1264 = vmatpush1.bf16.msra.mxu1 %v1280_v3 }
   0xb   :  { %550 = vmatprep.subr.bf16.mxu0 %v1453_v1  ;;  %1256 = vmatprep.subr.bf16.mxu1 %v1453_v1 }
   0xe   :  { %551 = vmatpush1.bf16.msra.mxu0 %v1281_v4  ;;  %1265 = vmatpush1.bf16.msra.mxu1 %v1281_v4 }
   0xf   :  { %552 = vmatprep.subr.bf16.mxu0 %v1453_v1  ;;  %1257 = vmatprep.subr.bf16.mxu1 %v1453_v1 }
  0x12   :  { %553 = vmatpush1.bf16.msra.mxu0 %v1282_v6  ;;  %1266 = vmatpush1.bf16.msra.mxu1 %v1282_v6 }
  0x13   :  { %554 = vmatprep.subr.bf16.mxu0 %v1453_v1  ;;  %1258 = vmatprep.subr.bf16.mxu1 %v1453_v1 }
  0x16   :  { %555 = vmatpush1.bf16.msra.mxu0 %v1283_v7  ;;  %1267 = vmatpush1.bf16.msra.mxu1 %v1283_v7 }
  0x17   :  { %556 = vmatprep.subr.bf16.mxu0 %v1453_v1  ;;  %1259 = vmatprep.subr.bf16.mxu1 %v1453_v1 }
  0x1a   :  { %557 = vmatpush1.bf16.msra.mxu0 %v1284_v9  ;;  %1268 = vmatpush1.bf16.msra.mxu1 %v1284_v9 }
  0x1b   :  { %558 = vmatprep.subr.bf16.mxu0 %v1453_v1  ;;  %1260 = vmatprep.subr.bf16.mxu1 %v1453_v1 }
  0x1e   :  { %559 = vmatpush1.bf16.msra.mxu0 %v1285_v10  ;;  %1269 = vmatpush1.bf16.msra.mxu1 %v1285_v10 }
  0x1f   :  { %560 = vmatprep.subr.bf16.mxu0 %v1453_v1  ;;  %1261 = vmatprep.subr.bf16.mxu1 %v1453_v1 }
  0x22   :  { %561 = vmatpush1.bf16.msra.mxu0 %v1286_v11  ;;  %1270 = vmatpush1.bf16.msra.mxu1 %v1286_v11 }
  0x25   :  { %577 = vmatmul.mubr.bf16.vlgmr.msra.gmra.mrb[0].mxu0 %v1287_v12  ;;  %705 = vmatmul.mubr.bf16.vlgmr.msra.gmra.mrb[0].mxu1 %v1311_v14 }
  0x26   :  { %1222 = vmatprep.mubr.msk.bf16.mxu0 %vm447_vm0, %v1290_v13  ;;  %1238 = vmatprep.mubr.msk.bf16.mxu1 %vm447_vm0, %v1317_v15 }
  0x2d   :  { %585 = vmatmul.mubr.bf16.gmra.mrb[4].mxu0 %v1292_v16  ;;  %713 = vmatmul.mubr.bf16.gmra.mrb[4].mxu1 %v1319_v18 }
  0x2e   :  { %1223 = vmatprep.mubr.msk.bf16.mxu0 %vm447_vm0, %v1293_v17  ;;  %1239 = vmatprep.mubr.msk.bf16.mxu1 %vm447_vm0, %v1323_v19 }
  0x2f   :  { %11 = vsyncpa [#allocation5], 0  ;;  %v1298_v24 = vld [vmem:[%s1979_s0 + $0x30] ss:$8 sps:$4 sm:$0xff]   ;;  %v1299_v26 = vld [vmem:[%s1979_s0 + $0x44] ss:$8 sps:$4 sm:$0xff]  }
  0x30   :  { %v1331_v25 = vld [vmem:[%s1979_s0 + $0x130] ss:$8 sps:$4 sm:$0xff]   ;;  %v1335_v27 = vld [vmem:[%s1979_s0 + $0x144] ss:$8 sps:$4 sm:$0xff]   ;;  %v1301_v28 = vld [vmem:[%s1979_s0 + $0x40] ss:$8 sps:$4 sm:$0xff]  }
  0x31   :  { %v1337_v29 = vld [vmem:[%s1979_s0 + $0x140] ss:$8 sps:$4 sm:$0xff]   ;;  %v1302_v30 = vld [vmem:[%s1979_s0 + $0x54] ss:$8 sps:$4 sm:$0xff]   ;;  %v1304_v32 = vld [vmem:[%s1979_s0 + $0x50] ss:$8 sps:$4 sm:$0xff]  }
  0x32   :  { %v1341_v31 = vld [vmem:[%s1979_s0 + $0x154] ss:$8 sps:$4 sm:$0xff]   ;;  %v1343_v33 = vld [vmem:[%s1979_s0 + $0x150] ss:$8 sps:$4 sm:$0xff]   ;;  %v1305_v34 = vld [vmem:[%s1979_s0 + $0x64] ss:$8 sps:$4 sm:$0xff]  }
  0x33   :  { %v1347_v35 = vld [vmem:[%s1979_s0 + $0x164] ss:$8 sps:$4 sm:$0xff]   ;;  %v1307_v36 = vld [vmem:[%s1979_s0 + $0x60] ss:$8 sps:$4 sm:$0xff]   ;;  %v1308_v38 = vld [vmem:[%s1979_s0 + $0x74] ss:$8 sps:$4 sm:$0xff]  }
  0x34   :  { %v1349_v37 = vld [vmem:[%s1979_s0 + $0x160] ss:$8 sps:$4 sm:$0xff]   ;;  %v1353_v39 = vld [vmem:[%s1979_s0 + $0x174] ss:$8 sps:$4 sm:$0xff]   ;;  %v1310_v40 = vld [vmem:[%s1979_s0 + $0x70] ss:$8 sps:$4 sm:$0xff]  }
  0x35   :  { %593 = vmatmul.mubr.bf16.gmra.mrb[8].mxu0 %v1295_v20  ;;  %721 = vmatmul.mubr.bf16.gmra.mrb[8].mxu1 %v1325_v22  ;;  %v1355_v41 = vld [vmem:[%s1979_s0 + $0x170] ss:$8 sps:$4 sm:$0xff]   ;;  %v1314_v42 = vld [vmem:[%s1979_s0 + $0x84] ss:$8 sps:$4 sm:$0xff]   ;;  %v1316_v44 = vld [vmem:[%s1979_s0 + $0x80] ss:$8 sps:$4 sm:$0xff]  }
  0x36   :  { %1224 = vmatprep.mubr.msk.bf16.mxu0 %vm447_vm0, %v1296_v21  ;;  %1240 = vmatprep.mubr.msk.bf16.mxu1 %vm447_vm0, %v1329_v23  ;;  %v1359_v43 = vld [vmem:[%s1979_s0 + $0x184] ss:$8 sps:$4 sm:$0xff]   ;;  %v1361_v45 = vld [vmem:[%s1979_s0 + $0x180] ss:$8 sps:$4 sm:$0xff]   ;;  %v1320_v46 = vld [vmem:[%s1979_s0 + $0x94] ss:$8 sps:$4 sm:$0xff]  }
  0x37   :  { %v1362_v47 = vld [vmem:[%s1979_s0 + $0x194] ss:$8 sps:$4 sm:$0xff]   ;;  %v1322_v48 = vld [vmem:[%s1979_s0 + $0x90] ss:$8 sps:$4 sm:$0xff]   ;;  %v1326_v50 = vld [vmem:[%s1979_s0 + $0xa4] ss:$8 sps:$4 sm:$0xff]  }
  0x38   :  { %v1364_v49 = vld [vmem:[%s1979_s0 + $0x190] ss:$8 sps:$4 sm:$0xff]   ;;  %v1365_v51 = vld [vmem:[%s1979_s0 + $0x1a4] ss:$8 sps:$4 sm:$0xff]   ;;  %v1328_v52 = vld [vmem:[%s1979_s0 + $0xa0] ss:$8 sps:$4 sm:$0xff]  }
  0x39   :  { %v1367_v53 = vld [vmem:[%s1979_s0 + $0x1a0] ss:$8 sps:$4 sm:$0xff]   ;;  %v1332_v54 = vld [vmem:[%s1979_s0 + $0xb4] ss:$8 sps:$4 sm:$0xff]   ;;  %v1334_v56 = vld [vmem:[%s1979_s0 + $0xb0] ss:$8 sps:$4 sm:$0xff]  }
  0x3a   :  { %v1368_v55 = vld [vmem:[%s1979_s0 + $0x1b4] ss:$8 sps:$4 sm:$0xff]   ;;  %v1370_v57 = vld [vmem:[%s1979_s0 + $0x1b0] ss:$8 sps:$4 sm:$0xff]   ;;  %v1338_v58 = vld [vmem:[%s1979_s0 + $0xc4] ss:$8 sps:$4 sm:$0xff]  }
  0x3b   :  { %v1371_v59 = vld [vmem:[%s1979_s0 + $0x1c4] ss:$8 sps:$4 sm:$0xff]   ;;  %v1340_v60 = vld [vmem:[%s1979_s0 + $0xc0] ss:$8 sps:$4 sm:$0xff]   ;;  %v1344_v62 = vld [vmem:[%s1979_s0 + $0xd4] ss:$8 sps:$4 sm:$0xff]  }
  0x3c   :  { %v1373_v61 = vld [vmem:[%s1979_s0 + $0x1c0] ss:$8 sps:$4 sm:$0xff]   ;;  %v1374_v63 = vld [vmem:[%s1979_s0 + $0x1d4] ss:$8 sps:$4 sm:$0xff]   ;;  %v1346_v0 = vld [vmem:[%s1979_s0 + $0xd0] ss:$8 sps:$4 sm:$0xff]  }
  0x3d   :  { %601 = vmatmul.mubr.bf16.gmra.mrb[12].mxu0 %v1298_v24  ;;  %729 = vmatmul.mubr.bf16.gmra.mrb[12].mxu1 %v1331_v25  ;;  %v1376_v1 = vld [vmem:[%s1979_s0 + $0x1d0] ss:$8 sps:$4 sm:$0xff]   ;;  %v1350_v2 = vld [vmem:[%s1979_s0 + $0xe4] ss:$8 sps:$4 sm:$0xff]   ;;  %v1352_v4 = vld [vmem:[%s1979_s0 + $0xe0] ss:$8 sps:$4 sm:$0xff]  }
  0x3e   :  { %1225 = vmatprep.mubr.msk.bf16.mxu0 %vm447_vm0, %v1299_v26  ;;  %1241 = vmatprep.mubr.msk.bf16.mxu1 %vm447_vm0, %v1335_v27  ;;  %v1377_v3 = vld [vmem:[%s1979_s0 + $0x1e4] ss:$8 sps:$4 sm:$0xff]   ;;  %v1379_v5 = vld [vmem:[%s1979_s0 + $0x1e0] ss:$8 sps:$4 sm:$0xff]   ;;  %v1356_v6 = vld [vmem:[%s1979_s0 + $0xf4] ss:$8 sps:$4 sm:$0xff]  }
  0x3f   :  { %v1380_v7 = vld [vmem:[%s1979_s0 + $0x1f4] ss:$8 sps:$4 sm:$0xff]   ;;  %v1358_v8 = vld [vmem:[%s1979_s0 + $0xf0] ss:$8 sps:$4 sm:$0xff]  }
  0x40   :  { %v1382_v9 = vld [vmem:[%s1979_s0 + $0x1f0] ss:$8 sps:$4 sm:$0xff]   ;;  %s1455_s0 = smov [#allocation2]  }
  0x41   :  { %s1110_s26 = sshll.u32 %s1455_s0, 4  ;;  %s1828_s26 = int_to_ptr.vmem [resolvable:$true] %s1110_s26 }
  0x42   :  { %s1383_s27 = scalar_lea.vmem %s1828_s26, 8192  ;;  %p1388_p1 = scmp.lt.s32.totalorder %s1828_s26, %s1828_s26 }
  0x43   :  { %p1384_p0 = scmp.ne.s32.totalorder %s1828_s26, %s1383_s27  ;;  %p1389_p2 = scmp.lt.s32.totalorder %s1383_s27, %s1383_s27 }
  0x45   :  { %609 = vmatmul.mubr.bf16.gmra.mrb[16].mxu0 %v1301_v28  ;;  %737 = vmatmul.mubr.bf16.gmra.mrb[16].mxu1 %v1337_v29  ;;  %p1390_p3 = por %p1389_p2, %p1388_p1 }
  0x46   :  { %1226 = vmatprep.mubr.msk.bf16.mxu0 %vm447_vm0, %v1302_v30  ;;  %1242 = vmatprep.mubr.msk.bf16.mxu1 %vm447_vm0, %v1341_v31 }
  0x47   :  { %p1391_p4 = pnand %p1390_p3, %p1384_p0 }
  0x4d   :  { %617 = vmatmul.mubr.bf16.gmra.mrb[20].mxu0 %v1304_v32  ;;  %745 = vmatmul.mubr.bf16.gmra.mrb[20].mxu1 %v1343_v33 }
  0x4e   :  { %1227 = vmatprep.mubr.msk.bf16.mxu0 %vm447_vm0, %v1305_v34  ;;  %1243 = vmatprep.mubr.msk.bf16.mxu1 %vm447_vm0, %v1347_v35 }
  0x55   :  { %625 = vmatmul.mubr.bf16.gmra.mrb[24].mxu0 %v1307_v36  ;;  %753 = vmatmul.mubr.bf16.gmra.mrb[24].mxu1 %v1349_v37 }
  0x56   :  { %1228 = vmatprep.mubr.msk.bf16.mxu0 %vm447_vm0, %v1308_v38  ;;  %1244 = vmatprep.mubr.msk.bf16.mxu1 %vm447_vm0, %v1353_v39 }
  0x5d   :  { %633 = vmatmul.mubr.bf16.gmra.mrb[28].mxu0 %v1310_v40  ;;  %761 = vmatmul.mubr.bf16.gmra.mrb[28].mxu1 %v1355_v41 }
  0x5e   :  { %1229 = vmatprep.mubr.msk.bf16.mxu0 %vm447_vm0, %v1314_v42  ;;  %1245 = vmatprep.mubr.msk.bf16.mxu1 %vm447_vm0, %v1359_v43 }
  0x65   :  { %641 = vmatmul.mubr.bf16.gmra.mrb[32].mxu0 %v1316_v44  ;;  %769 = vmatmul.mubr.bf16.gmra.mrb[32].mxu1 %v1361_v45 }
  0x66   :  { %1230 = vmatprep.mubr.msk.bf16.mxu0 %vm447_vm0, %v1320_v46  ;;  %1246 = vmatprep.mubr.msk.bf16.mxu1 %vm447_vm0, %v1362_v47 }
  0x6d   :  { %649 = vmatmul.mubr.bf16.gmra.mrb[36].mxu0 %v1322_v48  ;;  %777 = vmatmul.mubr.bf16.gmra.mrb[36].mxu1 %v1364_v49 }
  0x6e   :  { %1231 = vmatprep.mubr.msk.bf16.mxu0 %vm447_vm0, %v1326_v50  ;;  %1247 = vmatprep.mubr.msk.bf16.mxu1 %vm447_vm0, %v1365_v51 }
  0x75   :  { %657 = vmatmul.mubr.bf16.gmra.mrb[40].mxu0 %v1328_v52  ;;  %785 = vmatmul.mubr.bf16.gmra.mrb[40].mxu1 %v1367_v53 }
  0x76   :  { %1232 = vmatprep.mubr.msk.bf16.mxu0 %vm447_vm0, %v1332_v54  ;;  %1248 = vmatprep.mubr.msk.bf16.mxu1 %vm447_vm0, %v1368_v55 }
  0x7d   :  { %665 = vmatmul.mubr.bf16.gmra.mrb[44].mxu0 %v1334_v56  ;;  %793 = vmatmul.mubr.bf16.gmra.mrb[44].mxu1 %v1370_v57 }
  0x7e   :  { %1233 = vmatprep.mubr.msk.bf16.mxu0 %vm447_vm0, %v1338_v58  ;;  %1249 = vmatprep.mubr.msk.bf16.mxu1 %vm447_vm0, %v1371_v59 }
  0x85   :  { %673 = vmatmul.mubr.bf16.gmra.mrb[48].mxu0 %v1340_v60  ;;  %801 = vmatmul.mubr.bf16.gmra.mrb[48].mxu1 %v1373_v61 }
  0x86   :  { %1234 = vmatprep.mubr.msk.bf16.mxu0 %vm447_vm0, %v1344_v62  ;;  %1250 = vmatprep.mubr.msk.bf16.mxu1 %vm447_vm0, %v1374_v63 }
  0x8d   :  { %681 = vmatmul.mubr.bf16.gmra.mrb[52].mxu0 %v1346_v0  ;;  %809 = vmatmul.mubr.bf16.gmra.mrb[52].mxu1 %v1376_v1 }
  0x8e   :  { %1235 = vmatprep.mubr.msk.bf16.mxu0 %vm447_vm0, %v1350_v2  ;;  %1251 = vmatprep.mubr.msk.bf16.mxu1 %vm447_vm0, %v1377_v3 }
  0x95   :  { %689 = vmatmul.mubr.bf16.gmra.mrb[56].mxu0 %v1352_v4  ;;  %817 = vmatmul.mubr.bf16.gmra.mrb[56].mxu1 %v1379_v5 }
  0x96   :  { %1236 = vmatprep.mubr.msk.bf16.mxu0 %vm447_vm0, %v1356_v6  ;;  %1252 = vmatprep.mubr.msk.bf16.mxu1 %vm447_vm0, %v1380_v7 }
  0x9d   :  { %697 = vmatmul.mubr.bf16.gmra.mrb[60].mxu0 %v1358_v8  ;;  %825 = vmatmul.mubr.bf16.gmra.mrb[60].mxu1 %v1382_v9 }
  0xf8   :  { %v578_v10 = vpop.f32.mrb[0].mxu0  ;;  %v1736_v11 = vpop.f32.mrb[0].mxu1 }
  0xf9   :  { %1041 = vst [vmem:[#allocation2] sm:$0xff] %v578_v10  ;;  %v580_v12 = vpop.f32.mrb[1].mxu0  ;;  %1073 = vst [vmem:[#allocation2 + $0x100] sm:$0xff] %v1736_v11  ;;  %v708_v13 = vpop.f32.mrb[1].mxu1  ;;  %v906_v16 = vmul.f32 %v578_v10, %v578_v10 }
  0xfa   :  { %v581_v14 = vpop.f32.mrb[2].mxu0  ;;  %v1739_v15 = vpop.f32.mrb[2].mxu1 }
  0xfb   :  { %v834_v17 = vadd.f32 %v581_v14, %v578_v10  ;;  %v907_v18 = vmul.f32 %v581_v14, %v581_v14  ;;  %1042 = vst [vmem:[#allocation2 + $0x8] sm:$0xff] %v581_v14  ;;  %v583_v19 = vpop.f32.mrb[3].mxu0  ;;  %1074 = vst [vmem:[#allocation2 + $0x108] sm:$0xff] %v1739_v15  ;;  %v711_v20 = vpop.f32.mrb[3].mxu1 }
  0xfd   :  { %v970_v21 = vadd.f32 %v907_v18, %v906_v16 }
 0x100   :  { %v586_v22 = vpop.f32.mrb[4].mxu0  ;;  %v1742_v23 = vpop.f32.mrb[4].mxu1 }
 0x101   :  { %v835_v24 = vadd.f32 %v834_v17, %v586_v22  ;;  %v908_v25 = vmul.f32 %v586_v22, %v586_v22  ;;  %1043 = vst [vmem:[#allocation2 + $0x10] sm:$0xff] %v586_v22  ;;  %v588_v26 = vpop.f32.mrb[5].mxu0  ;;  %1075 = vst [vmem:[#allocation2 + $0x110] sm:$0xff] %v1742_v23  ;;  %v716_v27 = vpop.f32.mrb[5].mxu1 }
 0x102   :  { %v589_v28 = vpop.f32.mrb[6].mxu0  ;;  %v1745_v29 = vpop.f32.mrb[6].mxu1 }
 0x103   :  { %v971_v30 = vadd.f32 %v970_v21, %v908_v25  ;;  %v836_v31 = vadd.f32 %v835_v24, %v589_v28  ;;  %v909_v32 = vmul.f32 %v589_v28, %v589_v28  ;;  %1044 = vst [vmem:[#allocation2 + $0x18] sm:$0xff] %v589_v28  ;;  %v591_v33 = vpop.f32.mrb[7].mxu0  ;;  %1076 = vst [vmem:[#allocation2 + $0x118] sm:$0xff] %v1745_v29  ;;  %v719_v34 = vpop.f32.mrb[7].mxu1 }
 0x105   :  { %v972_v35 = vadd.f32 %v971_v30, %v909_v32 }
 0x108   :  { %v594_v36 = vpop.f32.mrb[8].mxu0  ;;  %v1748_v37 = vpop.f32.mrb[8].mxu1 }
 0x109   :  { %v837_v38 = vadd.f32 %v836_v31, %v594_v36  ;;  %v910_v39 = vmul.f32 %v594_v36, %v594_v36  ;;  %1045 = vst [vmem:[#allocation2 + $0x20] sm:$0xff] %v594_v36  ;;  %v596_v40 = vpop.f32.mrb[9].mxu0  ;;  %1077 = vst [vmem:[#allocation2 + $0x120] sm:$0xff] %v1748_v37  ;;  %v724_v41 = vpop.f32.mrb[9].mxu1 }
 0x10a   :  { %v597_v42 = vpop.f32.mrb[10].mxu0  ;;  %v1751_v43 = vpop.f32.mrb[10].mxu1 }
 0x10b   :  { %v973_v44 = vadd.f32 %v972_v35, %v910_v39  ;;  %v838_v45 = vadd.f32 %v837_v38, %v597_v42  ;;  %v911_v46 = vmul.f32 %v597_v42, %v597_v42  ;;  %1046 = vst [vmem:[#allocation2 + $0x28] sm:$0xff] %v597_v42  ;;  %v599_v47 = vpop.f32.mrb[11].mxu0  ;;  %1078 = vst [vmem:[#allocation2 + $0x128] sm:$0xff] %v1751_v43  ;;  %v727_v48 = vpop.f32.mrb[11].mxu1 }
 0x10d   :  { %v974_v49 = vadd.f32 %v973_v44, %v911_v46 }
 0x110   :  { %v602_v50 = vpop.f32.mrb[12].mxu0  ;;  %v1754_v51 = vpop.f32.mrb[12].mxu1 }
 0x111   :  { %v839_v52 = vadd.f32 %v838_v45, %v602_v50  ;;  %v912_v53 = vmul.f32 %v602_v50, %v602_v50  ;;  %1047 = vst [vmem:[#allocation2 + $0x30] sm:$0xff] %v602_v50  ;;  %v604_v54 = vpop.f32.mrb[13].mxu0  ;;  %1079 = vst [vmem:[#allocation2 + $0x130] sm:$0xff] %v1754_v51  ;;  %v732_v55 = vpop.f32.mrb[13].mxu1 }
 0x112   :  { %v605_v56 = vpop.f32.mrb[14].mxu0  ;;  %v1757_v57 = vpop.f32.mrb[14].mxu1 }
 0x113   :  { %v975_v58 = vadd.f32 %v974_v49, %v912_v53  ;;  %v840_v59 = vadd.f32 %v839_v52, %v605_v56  ;;  %v913_v60 = vmul.f32 %v605_v56, %v605_v56  ;;  %1048 = vst [vmem:[#allocation2 + $0x38] sm:$0xff] %v605_v56  ;;  %v607_v61 = vpop.f32.mrb[15].mxu0  ;;  %1080 = vst [vmem:[#allocation2 + $0x138] sm:$0xff] %v1757_v57  ;;  %v735_v62 = vpop.f32.mrb[15].mxu1 }
 0x115   :  { %v976_v63 = vadd.f32 %v975_v58, %v913_v60 }
 0x118   :  { %v610_v0 = vpop.f32.mrb[16].mxu0  ;;  %v1760_v1 = vpop.f32.mrb[16].mxu1 }
 0x119   :  { %v841_v2 = vadd.f32 %v840_v59, %v610_v0  ;;  %v914_v3 = vmul.f32 %v610_v0, %v610_v0  ;;  %1049 = vst [vmem:[#allocation2 + $0x40] sm:$0xff] %v610_v0  ;;  %v612_v4 = vpop.f32.mrb[17].mxu0  ;;  %1081 = vst [vmem:[#allocation2 + $0x140] sm:$0xff] %v1760_v1  ;;  %v740_v5 = vpop.f32.mrb[17].mxu1 }
 0x11a   :  { %v613_v6 = vpop.f32.mrb[18].mxu0  ;;  %v1763_v7 = vpop.f32.mrb[18].mxu1 }
 0x11b   :  { %v977_v8 = vadd.f32 %v976_v63, %v914_v3  ;;  %v842_v9 = vadd.f32 %v841_v2, %v613_v6  ;;  %v915_v10 = vmul.f32 %v613_v6, %v613_v6  ;;  %1050 = vst [vmem:[#allocation2 + $0x48] sm:$0xff] %v613_v6  ;;  %v615_v12 = vpop.f32.mrb[19].mxu0  ;;  %1082 = vst [vmem:[#allocation2 + $0x148] sm:$0xff] %v1763_v7  ;;  %v743_v13 = vpop.f32.mrb[19].mxu1 }
 0x11d   :  { %v978_v14 = vadd.f32 %v977_v8, %v915_v10  ;;  %v1454_v8 = vmov 0.0  }
 0x11e   :  { %21 = vst [vmem:[#allocation4] sm:$0x1] %v1454_v8  ;;  %22 = vst [vmem:[#allocation6] sm:$0x1] %v1454_v8 }
 0x120   :  { %v618_v16 = vpop.f32.mrb[20].mxu0  ;;  %v1766_v17 = vpop.f32.mrb[20].mxu1 }
 0x121   :  { %v843_v18 = vadd.f32 %v842_v9, %v618_v16  ;;  %v916_v19 = vmul.f32 %v618_v16, %v618_v16  ;;  %1051 = vst [vmem:[#allocation2 + $0x50] sm:$0xff] %v618_v16  ;;  %v620_v20 = vpop.f32.mrb[21].mxu0  ;;  %1083 = vst [vmem:[#allocation2 + $0x150] sm:$0xff] %v1766_v17  ;;  %v748_v21 = vpop.f32.mrb[21].mxu1 }
 0x122   :  { %v621_v22 = vpop.f32.mrb[22].mxu0  ;;  %v1769_v24 = vpop.f32.mrb[22].mxu1 }
 0x123   :  { %v979_v25 = vadd.f32 %v978_v14, %v916_v19  ;;  %v844_v26 = vadd.f32 %v843_v18, %v621_v22  ;;  %v917_v27 = vmul.f32 %v621_v22, %v621_v22  ;;  %1052 = vst [vmem:[#allocation2 + $0x58] sm:$0xff] %v621_v22  ;;  %v623_v28 = vpop.f32.mrb[23].mxu0  ;;  %1084 = vst [vmem:[#allocation2 + $0x158] sm:$0xff] %v1769_v24  ;;  %v751_v30 = vpop.f32.mrb[23].mxu1 }
 0x125   :  { %v980_v31 = vadd.f32 %v979_v25, %v917_v27 }
 0x128   :  { %v626_v32 = vpop.f32.mrb[24].mxu0  ;;  %v1772_v33 = vpop.f32.mrb[24].mxu1 }
 0x129   :  { %v845_v34 = vadd.f32 %v844_v26, %v626_v32  ;;  %v918_v35 = vmul.f32 %v626_v32, %v626_v32  ;;  %1053 = vst [vmem:[#allocation2 + $0x60] sm:$0xff] %v626_v32  ;;  %v628_v36 = vpop.f32.mrb[25].mxu0  ;;  %1085 = vst [vmem:[#allocation2 + $0x160] sm:$0xff] %v1772_v33  ;;  %v756_v38 = vpop.f32.mrb[25].mxu1 }
 0x12a   :  { %v629_v39 = vpop.f32.mrb[26].mxu0  ;;  %v1775_v40 = vpop.f32.mrb[26].mxu1 }
 0x12b   :  { %v981_v41 = vadd.f32 %v980_v31, %v918_v35  ;;  %v846_v42 = vadd.f32 %v845_v34, %v629_v39  ;;  %v919_v44 = vmul.f32 %v629_v39, %v629_v39  ;;  %1054 = vst [vmem:[#allocation2 + $0x68] sm:$0xff] %v629_v39  ;;  %v631_v45 = vpop.f32.mrb[27].mxu0  ;;  %1086 = vst [vmem:[#allocation2 + $0x168] sm:$0xff] %v1775_v40  ;;  %v759_v46 = vpop.f32.mrb[27].mxu1 }
 0x12d   :  { %v982_v47 = vadd.f32 %v981_v41, %v919_v44 }
 0x130   :  { %v634_v48 = vpop.f32.mrb[28].mxu0  ;;  %v1778_v49 = vpop.f32.mrb[28].mxu1 }
 0x131   :  { %v847_v50 = vadd.f32 %v846_v42, %v634_v48  ;;  %v920_v52 = vmul.f32 %v634_v48, %v634_v48  ;;  %1055 = vst [vmem:[#allocation2 + $0x70] sm:$0xff] %v634_v48  ;;  %v636_v53 = vpop.f32.mrb[29].mxu0  ;;  %1087 = vst [vmem:[#allocation2 + $0x170] sm:$0xff] %v1778_v49  ;;  %v764_v54 = vpop.f32.mrb[29].mxu1 }
 0x132   :  { %v637_v55 = vpop.f32.mrb[30].mxu0  ;;  %v1781_v56 = vpop.f32.mrb[30].mxu1 }
 0x133   :  { %v983_v58 = vadd.f32 %v982_v47, %v920_v52  ;;  %v848_v59 = vadd.f32 %v847_v50, %v637_v55  ;;  %v921_v60 = vmul.f32 %v637_v55, %v637_v55  ;;  %1056 = vst [vmem:[#allocation2 + $0x78] sm:$0xff] %v637_v55  ;;  %v639_v61 = vpop.f32.mrb[31].mxu0  ;;  %1088 = vst [vmem:[#allocation2 + $0x178] sm:$0xff] %v1781_v56  ;;  %v767_v62 = vpop.f32.mrb[31].mxu1 }
 0x135   :  { %v984_v63 = vadd.f32 %v983_v58, %v921_v60 }
 0x138   :  { %v642_v0 = vpop.f32.mrb[32].mxu0  ;;  %v1784_v2 = vpop.f32.mrb[32].mxu1 }
 0x139   :  { %v849_v3 = vadd.f32 %v848_v59, %v642_v0  ;;  %v922_v4 = vmul.f32 %v642_v0, %v642_v0  ;;  %1057 = vst [vmem:[#allocation2 + $0x80] sm:$0xff] %v642_v0  ;;  %v644_v5 = vpop.f32.mrb[33].mxu0  ;;  %1089 = vst [vmem:[#allocation2 + $0x180] sm:$0xff] %v1784_v2  ;;  %v772_v6 = vpop.f32.mrb[33].mxu1 }
 0x13a   :  { %v645_v9 = vpop.f32.mrb[34].mxu0  ;;  %v1787_v10 = vpop.f32.mrb[34].mxu1 }
 0x13b   :  { %v985_v12 = vadd.f32 %v984_v63, %v922_v4  ;;  %v850_v13 = vadd.f32 %v849_v3, %v645_v9  ;;  %v923_v14 = vmul.f32 %v645_v9, %v645_v9  ;;  %1058 = vst [vmem:[#allocation2 + $0x88] sm:$0xff] %v645_v9  ;;  %v647_v16 = vpop.f32.mrb[35].mxu0  ;;  %1090 = vst [vmem:[#allocation2 + $0x188] sm:$0xff] %v1787_v10  ;;  %v775_v18 = vpop.f32.mrb[35].mxu1 }
 0x13d   :  { %v986_v19 = vadd.f32 %v985_v12, %v923_v14 }
 0x140   :  { %v650_v20 = vpop.f32.mrb[36].mxu0  ;;  %v1790_v21 = vpop.f32.mrb[36].mxu1 }
 0x141   :  { %v851_v22 = vadd.f32 %v850_v13, %v650_v20  ;;  %v924_v25 = vmul.f32 %v650_v20, %v650_v20  ;;  %1059 = vst [vmem:[#allocation2 + $0x90] sm:$0xff] %v650_v20  ;;  %v652_v26 = vpop.f32.mrb[37].mxu0  ;;  %1091 = vst [vmem:[#allocation2 + $0x190] sm:$0xff] %v1790_v21  ;;  %v780_v27 = vpop.f32.mrb[37].mxu1 }
 0x142   :  { %v653_v28 = vpop.f32.mrb[38].mxu0  ;;  %v1793_v30 = vpop.f32.mrb[38].mxu1 }
 0x143   :  { %v987_v31 = vadd.f32 %v986_v19, %v924_v25  ;;  %v852_v32 = vadd.f32 %v851_v22, %v653_v28  ;;  %v925_v34 = vmul.f32 %v653_v28, %v653_v28  ;;  %1060 = vst [vmem:[#allocation2 + $0x98] sm:$0xff] %v653_v28  ;;  %v655_v35 = vpop.f32.mrb[39].mxu0  ;;  %1092 = vst [vmem:[#allocation2 + $0x198] sm:$0xff] %v1793_v30  ;;  %v783_v36 = vpop.f32.mrb[39].mxu1 }
 0x145   :  { %v988_v38 = vadd.f32 %v987_v31, %v925_v34 }
 0x148   :  { %v658_v39 = vpop.f32.mrb[40].mxu0  ;;  %v1796_v41 = vpop.f32.mrb[40].mxu1 }
 0x149   :  { %v853_v42 = vadd.f32 %v852_v32, %v658_v39  ;;  %v926_v44 = vmul.f32 %v658_v39, %v658_v39  ;;  %1061 = vst [vmem:[#allocation2 + $0xa0] sm:$0xff] %v658_v39  ;;  %v660_v45 = vpop.f32.mrb[41].mxu0  ;;  %1093 = vst [vmem:[#allocation2 + $0x1a0] sm:$0xff] %v1796_v41  ;;  %v788_v46 = vpop.f32.mrb[41].mxu1 }
 0x14a   :  { %v661_v47 = vpop.f32.mrb[42].mxu0  ;;  %v1799_v48 = vpop.f32.mrb[42].mxu1 }
 0x14b   :  { %v989_v50 = vadd.f32 %v988_v38, %v926_v44  ;;  %v854_v52 = vadd.f32 %v853_v42, %v661_v47  ;;  %v927_v53 = vmul.f32 %v661_v47, %v661_v47  ;;  %1062 = vst [vmem:[#allocation2 + $0xa8] sm:$0xff] %v661_v47  ;;  %v663_v54 = vpop.f32.mrb[43].mxu0  ;;  %1094 = vst [vmem:[#allocation2 + $0x1a8] sm:$0xff] %v1799_v48  ;;  %v791_v55 = vpop.f32.mrb[43].mxu1 }
 0x14d   :  { %v990_v58 = vadd.f32 %v989_v50, %v927_v53 }
 0x150   :  { %v666_v59 = vpop.f32.mrb[44].mxu0  ;;  %v1802_v60 = vpop.f32.mrb[44].mxu1 }
 0x151   :  { %v855_v61 = vadd.f32 %v854_v52, %v666_v59  ;;  %v928_v62 = vmul.f32 %v666_v59, %v666_v59  ;;  %1063 = vst [vmem:[#allocation2 + $0xb0] sm:$0xff] %v666_v59  ;;  %v668_v63 = vpop.f32.mrb[45].mxu0  ;;  %1095 = vst [vmem:[#allocation2 + $0x1b0] sm:$0xff] %v1802_v60  ;;  %v796_v0 = vpop.f32.mrb[45].mxu1 }
 0x152   :  { %v669_v3 = vpop.f32.mrb[46].mxu0  ;;  %v1805_v4 = vpop.f32.mrb[46].mxu1 }
 0x153   :  { %v991_v5 = vadd.f32 %v990_v58, %v928_v62  ;;  %v856_v6 = vadd.f32 %v855_v61, %v669_v3  ;;  %v929_v8 = vmul.f32 %v669_v3, %v669_v3  ;;  %1064 = vst [vmem:[#allocation2 + $0xb8] sm:$0xff] %v669_v3  ;;  %v671_v9 = vpop.f32.mrb[47].mxu0  ;;  %1096 = vst [vmem:[#allocation2 + $0x1b8] sm:$0xff] %v1805_v4  ;;  %v799_v12 = vpop.f32.mrb[47].mxu1 }
 0x155   :  { %v992_v13 = vadd.f32 %v991_v5, %v929_v8 }
 0x158   :  { %v674_v14 = vpop.f32.mrb[48].mxu0  ;;  %v1808_v16 = vpop.f32.mrb[48].mxu1 }
 0x159   :  { %v857_v18 = vadd.f32 %v856_v6, %v674_v14  ;;  %v930_v19 = vmul.f32 %v674_v14, %v674_v14  ;;  %1065 = vst [vmem:[#allocation2 + $0xc0] sm:$0xff] %v674_v14  ;;  %v676_v20 = vpop.f32.mrb[49].mxu0  ;;  %1097 = vst [vmem:[#allocation2 + $0x1c0] sm:$0xff] %v1808_v16  ;;  %v804_v22 = vpop.f32.mrb[49].mxu1 }
 0x15a   :  { %v677_v25 = vpop.f32.mrb[50].mxu0  ;;  %v1811_v26 = vpop.f32.mrb[50].mxu1 }
 0x15b   :  { %v993_v27 = vadd.f32 %v992_v13, %v930_v19  ;;  %v858_v28 = vadd.f32 %v857_v18, %v677_v25  ;;  %v931_v31 = vmul.f32 %v677_v25, %v677_v25  ;;  %1066 = vst [vmem:[#allocation2 + $0xc8] sm:$0xff] %v677_v25  ;;  %v679_v32 = vpop.f32.mrb[51].mxu0  ;;  %1098 = vst [vmem:[#allocation2 + $0x1c8] sm:$0xff] %v1811_v26  ;;  %v807_v34 = vpop.f32.mrb[51].mxu1 }
 0x15d   :  { %v994_v35 = vadd.f32 %v993_v27, %v931_v31 }
 0x160   :  { %v682_v36 = vpop.f32.mrb[52].mxu0  ;;  %v1814_v38 = vpop.f32.mrb[52].mxu1 }
 0x161   :  { %v859_v39 = vadd.f32 %v858_v28, %v682_v36  ;;  %v932_v42 = vmul.f32 %v682_v36, %v682_v36  ;;  %1067 = vst [vmem:[#allocation2 + $0xd0] sm:$0xff] %v682_v36  ;;  %v684_v44 = vpop.f32.mrb[53].mxu0  ;;  %1099 = vst [vmem:[#allocation2 + $0x1d0] sm:$0xff] %v1814_v38  ;;  %v812_v45 = vpop.f32.mrb[53].mxu1 }
 0x162   :  { %v685_v46 = vpop.f32.mrb[54].mxu0  ;;  %v1817_v47 = vpop.f32.mrb[54].mxu1 }
 0x163   :  { %v995_v50 = vadd.f32 %v994_v35, %v932_v42  ;;  %v860_v52 = vadd.f32 %v859_v39, %v685_v46  ;;  %v933_v53 = vmul.f32 %v685_v46, %v685_v46  ;;  %1068 = vst [vmem:[#allocation2 + $0xd8] sm:$0xff] %v685_v46  ;;  %v687_v54 = vpop.f32.mrb[55].mxu0  ;;  %1100 = vst [vmem:[#allocation2 + $0x1d8] sm:$0xff] %v1817_v47  ;;  %v815_v55 = vpop.f32.mrb[55].mxu1 }
 0x165   :  { %v996_v58 = vadd.f32 %v995_v50, %v933_v53 }
 0x168   :  { %v690_v59 = vpop.f32.mrb[56].mxu0  ;;  %v1820_v61 = vpop.f32.mrb[56].mxu1 }
 0x169   :  { %v861_v62 = vadd.f32 %v860_v52, %v690_v59  ;;  %v934_v63 = vmul.f32 %v690_v59, %v690_v59  ;;  %1069 = vst [vmem:[#allocation2 + $0xe0] sm:$0xff] %v690_v59  ;;  %v692_v0 = vpop.f32.mrb[57].mxu0  ;;  %1101 = vst [vmem:[#allocation2 + $0x1e0] sm:$0xff] %v1820_v61  ;;  %v820_v3 = vpop.f32.mrb[57].mxu1 }
 0x16a   :  { %v693_v5 = vpop.f32.mrb[58].mxu0  ;;  %v1823_v6 = vpop.f32.mrb[58].mxu1 }
 0x16b   :  { %v997_v8 = vadd.f32 %v996_v58, %v934_v63  ;;  %v862_v9 = vadd.f32 %v861_v62, %v693_v5  ;;  %v935_v12 = vmul.f32 %v693_v5, %v693_v5  ;;  %1070 = vst [vmem:[#allocation2 + $0xe8] sm:$0xff] %v693_v5  ;;  %v695_v13 = vpop.f32.mrb[59].mxu0  ;;  %1102 = vst [vmem:[#allocation2 + $0x1e8] sm:$0xff] %v1823_v6  ;;  %v823_v14 = vpop.f32.mrb[59].mxu1 }
 0x16d   :  { %v998_v18 = vadd.f32 %v997_v8, %v935_v12 }
 0x170   :  { %v698_v19 = vpop.f32.mrb[60].mxu0  ;;  %v1826_v20 = vpop.f32.mrb[60].mxu1 }
 0x171   :  { %v863_v22 = vadd.f32 %v862_v9, %v698_v19  ;;  %v936_v25 = vmul.f32 %v698_v19, %v698_v19  ;;  %1071 = vst [vmem:[#allocation2 + $0xf0] sm:$0xff] %v698_v19  ;;  %v700_v27 = vpop.f32.mrb[61].mxu0  ;;  %1103 = vst [vmem:[#allocation2 + $0x1f0] sm:$0xff] %v1826_v20  ;;  %v828_v28 = vpop.f32.mrb[61].mxu1 }
 0x172   :  { %v701_v31 = vpop.f32.mrb[62].mxu0  ;;  %v1831_v32 = vpop.f32.mrb[62].mxu1 }
 0x173   :  { %v999_v34 = vadd.f32 %v998_v18, %v936_v25  ;;  %v864_v35 = vadd.f32 %v863_v22, %v701_v31  ;;  %v937_v36 = vmul.f32 %v701_v31, %v701_v31  ;;  %1072 = vst [vmem:[#allocation2 + $0xf8] sm:$0xff] %v701_v31  ;;  %v703_v39 = vpop.f32.mrb[63].mxu0  ;;  %1104 = vst [vmem:[#allocation2 + $0x1f8] sm:$0xff] %v1831_v32  ;;  %v831_v42 = vpop.f32.mrb[63].mxu1 }
 0x174   :  { %1394 = shalt.err (!%p1391_p4)
}
 0x175   :  { %s1395_s30 = scalar_lea.hbm %s1981_s2, 8192 }
 0x176   :  { %p1396_p5 = scmp.ne.s32.totalorder %s1981_s2, %s1395_s30  ;;  %p1399_p6 = scmp.lt.u32.totalorder %s1395_s30, %s1981_s2 }
 0x178   :  { %p1401_p7 = pnand %p1399_p6, %p1396_p5 }
 0x17a   :  { %1404 = shalt.err (!%p1401_p7)
}
 0x17b   :  { %s1456_s9 = smov 128   ;;  %s1457_s10 = smov 8   ;;  %v938_v44 = vmul.f32 %v1736_v11, %v1736_v11  ;;  %v865_v45 = vadd.f32 %v864_v35, %v1736_v11  ;;  %v1000_v46 = vadd.f32 %v999_v34, %v937_v36  ;;  %v939_v50 = vmul.f32 %v1739_v15, %v1739_v15 }
 0x17c   :  { %1116 = dma.vmem_to_hbm [thread:$0]  %s1828_s26, 8192, %s1981_s2, [#allocation3], %s1456_s9, %s1456_s9, %s1457_s10   ;;  %v940_v54 = vmul.f32 %v1742_v23, %v1742_v23  ;;  %v941_v59 = vmul.f32 %v1745_v29, %v1745_v29  ;;  %v942_v11 = vmul.f32 %v1748_v37, %v1748_v37 }
 0x17d   :  { %v866_v52 = vadd.f32 %v865_v45, %v1739_v15  ;;  %v1001_v53 = vadd.f32 %v1000_v46, %v938_v44  ;;  %v943_v15 = vmul.f32 %v1751_v43, %v1751_v43  ;;  %s1458_s2 = smov [#allocation4]   ;;  %s1459_s14 = smov [#allocation6]  }
 0x17e   :  { %s1123_s13 = sshll.u32 %s1458_s2, 4  ;;  %s1133_s15 = sshll.u32 %s1459_s14, 4  ;;  %s1124_s13 = int_to_ptr.vmem [resolvable:$true] %s1123_s13  ;;  %s1947_s15 = int_to_ptr.vmem [resolvable:$true] %s1133_s15 }
 0x17f   :  { %v867_v55 = vadd.f32 %v866_v52, %v1742_v23  ;;  %v1002_v58 = vadd.f32 %v1001_v53, %v939_v50  ;;  %v944_v23 = vmul.f32 %v1754_v51, %v1754_v51  ;;  %v954_v52 = vmul.f32 %v1784_v2, %v1784_v2  ;;  %s1405_s16 = scalar_lea.vmem %s1124_s13, 16  ;;  %s1409_s17 = scalar_lea.vmem %s1124_s13, 32 }
 0x180   :  { %p1406_p8 = scmp.ne.s32.totalorder %s1124_s13, %s1405_s16  ;;  %p1410_p9 = scmp.lt.s32.totalorder %s1124_s13, %s1124_s13 }
 0x181   :  { %v868_v62 = vadd.f32 %v867_v55, %v1745_v29  ;;  %v1003_v63 = vadd.f32 %v1002_v58, %v940_v54  ;;  %v945_v29 = vmul.f32 %v1757_v57, %v1757_v57  ;;  %v955_v55 = vmul.f32 %v1787_v10, %v1787_v10  ;;  %p1411_p10 = scmp.lt.s32.totalorder %s1409_s17, %s1405_s16 }
 0x183   :  { %v869_v0 = vadd.f32 %v868_v62, %v1748_v37  ;;  %v1004_v3 = vadd.f32 %v1003_v63, %v941_v59  ;;  %v946_v37 = vmul.f32 %v1760_v1, %v1760_v1  ;;  %v956_v59 = vmul.f32 %v1790_v21, %v1790_v21  ;;  %p1412_p11 = por %p1411_p10, %p1410_p9 }
 0x184   :  { %v957_v63 = vmul.f32 %v1793_v30, %v1793_v30 }
 0x185   :  { %v870_v5 = vadd.f32 %v869_v0, %v1751_v43  ;;  %v1005_v8 = vadd.f32 %v1004_v3, %v942_v11  ;;  %v947_v43 = vmul.f32 %v1763_v7, %v1763_v7  ;;  %v958_v0 = vmul.f32 %v1796_v41, %v1796_v41  ;;  %p1413_p12 = pnand %p1412_p11, %p1406_p8 }
 0x187   :  { %v871_v9 = vadd.f32 %v870_v5, %v1754_v51  ;;  %v1006_v12 = vadd.f32 %v1005_v8, %v943_v15  ;;  %v948_v51 = vmul.f32 %v1766_v17, %v1766_v17  ;;  %v959_v15 = vmul.f32 %v1799_v48, %v1799_v48 }
 0x188   :  { %v960_v8 = vmul.f32 %v1802_v60, %v1802_v60 }
 0x189   :  { %v872_v13 = vadd.f32 %v871_v9, %v1757_v57  ;;  %v1007_v14 = vadd.f32 %v1006_v12, %v944_v23  ;;  %v949_v57 = vmul.f32 %v1769_v24, %v1769_v24  ;;  %v961_v9 = vmul.f32 %v1805_v4, %v1805_v4 }
 0x18b   :  { %v1008_v18 = vadd.f32 %v1007_v14, %v945_v29  ;;  %v873_v19 = vadd.f32 %v872_v13, %v1760_v1  ;;  %v950_v1 = vmul.f32 %v1772_v33, %v1772_v33  ;;  %v962_v29 = vmul.f32 %v1808_v16, %v1808_v16 }
 0x18c   :  { %v963_v14 = vmul.f32 %v1811_v26, %v1811_v26 }
 0x18d   :  { %v874_v22 = vadd.f32 %v873_v19, %v1763_v7  ;;  %v1009_v25 = vadd.f32 %v1008_v18, %v946_v37  ;;  %v951_v7 = vmul.f32 %v1775_v40, %v1775_v40  ;;  %v964_v18 = vmul.f32 %v1814_v38, %v1814_v38 }
 0x18f   :  { %v875_v27 = vadd.f32 %v874_v22, %v1766_v17  ;;  %v1010_v28 = vadd.f32 %v1009_v25, %v947_v43  ;;  %v952_v17 = vmul.f32 %v1778_v49, %v1778_v49  ;;  %v965_v43 = vmul.f32 %v1817_v47, %v1817_v47 }
 0x190   :  { %v966_v25 = vmul.f32 %v1820_v61, %v1820_v61 }
 0x191   :  { %v876_v31 = vadd.f32 %v875_v27, %v1769_v24  ;;  %v1011_v34 = vadd.f32 %v1010_v28, %v948_v51  ;;  %v953_v24 = vmul.f32 %v1781_v56, %v1781_v56  ;;  %v967_v27 = vmul.f32 %v1823_v6, %v1823_v6 }
 0x193   :  { %v877_v35 = vadd.f32 %v876_v31, %v1772_v33  ;;  %v1012_v36 = vadd.f32 %v1011_v34, %v949_v57  ;;  %v969_v34 = vmul.f32 %v1831_v32, %v1831_v32 }
 0x195   :  { %v878_v39 = vadd.f32 %v877_v35, %v1775_v40  ;;  %v1013_v42 = vadd.f32 %v1012_v36, %v950_v1 }
 0x197   :  { %v879_v44 = vadd.f32 %v878_v39, %v1778_v49  ;;  %v1014_v45 = vadd.f32 %v1013_v42, %v951_v7 }
 0x199   :  { %v880_v46 = vadd.f32 %v879_v44, %v1781_v56  ;;  %v1015_v50 = vadd.f32 %v1014_v45, %v952_v17  ;;  %v833_v45 = vld [vmem:[#allocation4] sm:$0x1] }
 0x19b   :  { %v881_v33 = vadd.f32 %v880_v46, %v1784_v2  ;;  %v1016_v53 = vadd.f32 %v1015_v50, %v953_v24  ;;  %v905_v46 = vld [vmem:[#allocation6] sm:$0x1] }
 0x19d   :  { %v1017_v40 = vadd.f32 %v1016_v53, %v954_v52  ;;  %v882_v54 = vadd.f32 %v881_v33, %v1787_v10 }
 0x19f   :  { %v1018_v49 = vadd.f32 %v1017_v40, %v955_v55  ;;  %v883_v58 = vadd.f32 %v882_v54, %v1790_v21 }
 0x1a1   :  { %v1019_v56 = vadd.f32 %v1018_v49, %v956_v59  ;;  %v884_v62 = vadd.f32 %v883_v58, %v1793_v30 }
 0x1a3   :  { %v1020_v2 = vadd.f32 %v1019_v56, %v957_v63  ;;  %v885_v11 = vadd.f32 %v884_v62, %v1796_v41 }
 0x1a5   :  { %v1021_v3 = vadd.f32 %v1020_v2, %v958_v0  ;;  %v886_v10 = vadd.f32 %v885_v11, %v1799_v48 }
 0x1a7   :  { %v1022_v5 = vadd.f32 %v1021_v3, %v959_v15  ;;  %v887_v21 = vadd.f32 %v886_v10, %v1802_v60 }
 0x1a9   :  { %v1023_v23 = vadd.f32 %v1022_v5, %v960_v8  ;;  %v888_v30 = vadd.f32 %v887_v21, %v1805_v4 }
 0x1ab   :  { %v1024_v12 = vadd.f32 %v1023_v23, %v961_v9  ;;  %v889_v41 = vadd.f32 %v888_v30, %v1808_v16 }
 0x1ad   :  { %v1025_v13 = vadd.f32 %v1024_v12, %v962_v29  ;;  %v890_v48 = vadd.f32 %v889_v41, %v1811_v26 }
 0x1af   :  { %v1026_v37 = vadd.f32 %v1025_v13, %v963_v14  ;;  %v891_v60 = vadd.f32 %v890_v48, %v1814_v38  ;;  %v968_v38 = vmul.f32 %v1826_v20, %v1826_v20 }
 0x1b1   :  { %v1027_v19 = vadd.f32 %v1026_v37, %v964_v18  ;;  %v892_v4 = vadd.f32 %v891_v60, %v1817_v47 }
 0x1b3   :  { %v1028_v22 = vadd.f32 %v1027_v19, %v965_v43  ;;  %v893_v16 = vadd.f32 %v892_v4, %v1820_v61 }
 0x1b5   :  { %v1029_v51 = vadd.f32 %v1028_v22, %v966_v25  ;;  %v894_v26 = vadd.f32 %v893_v16, %v1823_v6 }
 0x1b7   :  { %v1030_v28 = vadd.f32 %v1029_v51, %v967_v27  ;;  %v895_v57 = vadd.f32 %v894_v26, %v1826_v20 }
 0x1b9   :  { %v1031_v31 = vadd.f32 %v1030_v28, %v968_v38  ;;  %v896_v47 = vadd.f32 %v895_v57, %v1831_v32 }
 0x1bb   :  { %v897_v1 = vrot.slane %v896_v47, 4  ;;  %v1032_v61 = vadd.f32 %v1031_v31, %v969_v34 }
 0x1bd   :  { %v898_v35 = vadd.f32 %v897_v1, %v896_v47  ;;  %v1033_v36 = vrot.slane %v1032_v61, 4 }
 0x1bf   :  { %v899_v7 = vrot.slane %v898_v35, 2  ;;  %v1034_v39 = vadd.f32 %v1033_v36, %v1032_v61 }
 0x1c1   :  { %v900_v42 = vadd.f32 %v899_v7, %v898_v35  ;;  %v1035_v6 = vrot.slane %v1034_v39, 2 }
 0x1c3   :  { %v901_v17 = vrot.slane %v900_v42, 1  ;;  %v1036_v44 = vadd.f32 %v1035_v6, %v1034_v39 }
 0x1c5   :  { %v902_v20 = vadd.f32 %v901_v17, %v900_v42  ;;  %v1037_v24 = vrot.slane %v1036_v44, 1 }
 0x1c7   :  { %v903_v50 = vadd.f32 %v902_v20, %v833_v45  ;;  %v1038_v32 = vadd.f32 %v1037_v24, %v1036_v44 }
 0x1c9   :  { %904 = vst [vmem:[#allocation4] sm:$0x1] %v903_v50  ;;  %v1039_v33 = vadd.f32 %v1038_v32, %v905_v46 }
 0x1ca   :  { %1416 = shalt.err (!%p1413_p12)
}
 0x1cb   :  { %s1417_s19 = scalar_lea.hbm %s1982_s3, 16 }
 0x1cc   :  { %p1418_p13 = scmp.ne.s32.totalorder %s1982_s3, %s1417_s19  ;;  %p1421_p0 = scmp.lt.u32.totalorder %s1417_s19, %s1982_s3 }
 0x1ce   :  { %p1423_p1 = pnand %p1421_p0, %p1418_p13 }
 0x1d0   :  { %1426 = shalt.err (!%p1423_p1)
}
 0x1d1   :  { %1126 = dma.vmem_to_hbm [thread:$0]  %s1124_s13, 16, %s1982_s3, [#allocation5]   ;;  %1040 = vst [vmem:[#allocation6] sm:$0x1] %v1039_v33 }
 0x1d2   :  { %s1427_s0 = scalar_lea.vmem %s1947_s15, 16  ;;  %s1431_s26 = scalar_lea.vmem %s1947_s15, 32 }
 0x1d3   :  { %p1428_p2 = scmp.ne.s32.totalorder %s1947_s15, %s1427_s0  ;;  %p1432_p3 = scmp.lt.s32.totalorder %s1947_s15, %s1947_s15 }
 0x1d4   :  { %p1433_p4 = scmp.lt.s32.totalorder %s1431_s26, %s1427_s0 }
 0x1d6   :  { %p1434_p5 = por %p1433_p4, %p1432_p3 }
 0x1d8   :  { %p1435_p6 = pnand %p1434_p5, %p1428_p2 }
 0x1da   :  { %1438 = shalt.err (!%p1435_p6)
}
 0x1db   :  { %s1439_s29 = scalar_lea.hbm %s1983_s4, 16 }
 0x1dc   :  { %p1440_p7 = scmp.ne.s32.totalorder %s1983_s4, %s1439_s29  ;;  %p1443_p8 = scmp.lt.u32.totalorder %s1439_s29, %s1983_s4 }
 0x1de   :  { %p1445_p9 = pnand %p1443_p8, %p1440_p7 }
 0x1e0   :  { %1448 = shalt.err (!%p1445_p9)
}
 0x1e1   :  { %1136 = dma.vmem_to_hbm [thread:$0]  %s1947_s15, 16, %s1983_s4, [#allocation5]  }
 0x1e2   :  { %1449 = dma.done.wait [#allocation3], 8192  }
 0x1e3   :  { %1450 = vsyncadd [#allocation3], 4294959104 }
 0x1e4   :  { %1451 = dma.done.wait [#allocation5], 32  }
 0x1e5   :  { %1452 = vsyncadd [#allocation5], 4294967264 }
 0x1e6   :  { %1146 = vsyncpa [#allocation3], 1 }
 0x1e7   :  { %1147 = vsyncpa [#allocation5], 1 }

</bundles_post_ra>
